<compile_context>
chip_gen: v7x
topology: tpu7x:2x2x1
jax: 0.10.0
libtpu: 0.0.40
codegen_flags: <defaults>
</compile_context>

<pallas_src>
import functools

import jax
import jax.numpy as jnp
from jax.experimental import pallas as pl
from jax.experimental.pallas import tpu as pltpu


def _conv1x1_bn_kernel(x_ref, w_ref, shift_ref, o_ref, *, apply_relu):
    # x_ref:     (C_in, TILE_M)   activation tile (bf16 or f32)
    # w_ref:     (C_out, C_in)    BN-scale-folded weight (bf16)
    # shift_ref: (C_out, 1)       BN shift (f32)
    # o_ref:     (C_out, TILE_M)  output tile (f32), lane-dense on M
    x = x_ref[...].astype(jnp.bfloat16)
    y = jnp.dot(w_ref[...], x, preferred_element_type=jnp.float32)   # (C_out, TILE_M)
    y = y + shift_ref[...]                                           # broadcast over lanes
    if apply_relu:
        y = jnp.maximum(y, 0.0)
    o_ref[...] = y.astype(o_ref.dtype)


def _pick_tile_m(m, cap=1024):
    if m <= 128:
        return m                                   # full-dim block satisfies the (8,128) rule
    return max(128, (min(m, cap) // 128) * 128)    # lane-dense multiple of 128


def conv_bn_forward(x_nchw, weight, gamma, beta, running_mean, running_var,
                    *, bias=None, stride=1, eps=1e-5, relu=True, tile_m_cap=1024):
    """x_nchw: (N, C_in, H, W); weight: (C_out, C_in, 1, 1) (PyTorch layout)."""
    N, C_in, H, W = x_nchw.shape
    C_out = weight.shape[0]
    assert weight.shape[2] == 1 and weight.shape[3] == 1, "only 1x1 conv implemented"

    # Fold eval-mode BN (and optional conv bias) into the conv: scale -> weight, shift -> add.
    scale = gamma / jnp.sqrt(running_var + eps)                        # (C_out,)
    shift = beta - running_mean * scale                                # (C_out,)
    if bias is not None:
        shift = shift + bias * scale
    w2d = (weight[:, :, 0, 0].astype(jnp.float32) * scale[:, None]).astype(jnp.bfloat16)
    shift2d = shift.astype(jnp.float32).reshape(C_out, 1)

    # Strided 1x1 conv == spatial subsample. Keep NCHW (no transpose); when stride > 1 the
    # subsample is fused with the bf16 downcast so the kernel streams 4x less activation data.
    if stride != 1:
        xs = x_nchw[:, :, ::stride, ::stride].astype(jnp.bfloat16)
    else:
        xs = x_nchw
    Ho, Wo = xs.shape[2], xs.shape[3]
    M = Ho * Wo
    x3d = xs.reshape(N, C_in, M)          # free reshape: (H, W) contiguous in NCHW

    TILE_M = _pick_tile_m(M, tile_m_cap)
    grid = (N, pl.cdiv(M, TILE_M))

    kernel = functools.partial(_conv1x1_bn_kernel, apply_relu=relu)
    out3d = pl.pallas_call(
        kernel,
        out_shape=jax.ShapeDtypeStruct((N, C_out, M), jnp.float32),
        grid=grid,
        in_specs=[
            pl.BlockSpec((None, C_in, TILE_M), lambda n, t: (n, 0, t)),   # activation tile
            pl.BlockSpec((C_out, C_in), lambda n, t: (0, 0)),             # folded weight (resident)
            pl.BlockSpec((C_out, 1), lambda n, t: (0, 0)),                # BN shift (resident)
        ],
        out_specs=pl.BlockSpec((None, C_out, TILE_M), lambda n, t: (n, 0, t)),
        compiler_params=pltpu.CompilerParams(
            dimension_semantics=("parallel", "parallel"),
            vmem_limit_bytes=48 * 1024 * 1024,
        ),
    )(x3d, w2d, shift2d)

    return out3d.reshape(N, C_out, Ho, Wo)   # free reshape; already NCHW


def _reference(x, weight, gamma, beta, mean, var, *, bias, stride, eps, relu):
    xs = x[:, :, ::stride, ::stride]
    y = jnp.einsum("oc,nchw->nohw", weight[:, :, 0, 0], xs,
                   precision=jax.lax.Precision.HIGHEST)
    if bias is not None:
        y = y + bias[None, :, None, None]
    scale = gamma / jnp.sqrt(var + eps)
    y = y * scale[None, :, None, None] + (beta - mean * scale)[None, :, None, None]
    if relu:
        y = jnp.maximum(y, 0.0)
    return y


if __name__ == "__main__":
    key = jax.random.PRNGKey(0)
    k_x, k_w, k_g, k_b, k_m, k_v = jax.random.split(key, 6)

    N, C_in, H, W = 2, 4, 16, 16
    C_out, stride = 8, 2

    x = jax.random.normal(k_x, (N, C_in, H, W), dtype=jnp.float32)
    weight = jax.random.normal(k_w, (C_out, C_in, 1, 1), dtype=jnp.float32) * 0.1
    gamma = jax.random.normal(k_g, (C_out,), dtype=jnp.float32) * 0.1 + 1.0
    beta = jax.random.normal(k_b, (C_out,), dtype=jnp.float32) * 0.1
    running_mean = jax.random.normal(k_m, (C_out,), dtype=jnp.float32) * 0.1
    running_var = jax.random.uniform(k_v, (C_out,), dtype=jnp.float32) + 0.5

    out = conv_bn_forward(x, weight, gamma, beta, running_mean, running_var,
                          bias=None, stride=stride, relu=True)
    jax.block_until_ready(out)
    assert out.shape == (N, C_out, H // stride, W // stride)

    ref = _reference(x, weight, gamma, beta, running_mean, running_var,
                     bias=None, stride=stride, eps=1e-5, relu=True)
    assert jnp.allclose(out, ref, atol=3e-2, rtol=3e-2), float(jnp.max(jnp.abs(out - ref)))

    print("KERNEL_OK")
</pallas_src>

<mosaic_0001>
module attributes {stable_mosaic.version = 11 : i64} {
  func.func @_conv1x1_bn_kernel(%arg0: i32, %arg1: i32, %arg2: memref<1x4x64xbf16, #tpu.memory_space<vmem>>, %arg3: memref<8x4xbf16, #tpu.memory_space<vmem>>, %arg4: memref<8x1xf32, #tpu.memory_space<vmem>>, %arg5: memref<1x8x64xf32, #tpu.memory_space<vmem>>) attributes {dimension_semantics = [#tpu.dimension_semantics<parallel>, #tpu.dimension_semantics<parallel>], iteration_bounds = array<i64: 2, 1>, scalar_prefetch = 0 : i64, scratch_operands = 0 : i64, tpu.core_type = #tpu.core_type<tc>, window_params = [{transform_indices = @transform_0, window_bounds = array<i64: 1, 4, 64>}, {pipeline_mode = #tpu.pipeline_mode<synchronous>, transform_indices = @transform_1, window_bounds = array<i64: 8, 4>}, {pipeline_mode = #tpu.pipeline_mode<synchronous>, transform_indices = @transform_2, window_bounds = array<i64: 8, 1>}, {transform_indices = @transform_3, window_bounds = array<i64: 1, 8, 64>}]} {
    %c0 = arith.constant 0 : index
    %c0_0 = arith.constant 0 : index
    %c0_1 = arith.constant 0 : index
    %0 = vector.load %arg2[%c0, %c0_0, %c0_1] : memref<1x4x64xbf16, #tpu.memory_space<vmem>>, vector<1x4x64xbf16>
    %1 = vector.shape_cast %0 : vector<1x4x64xbf16> to vector<4x64xbf16>
    %c0_2 = arith.constant 0 : index
    %c0_3 = arith.constant 0 : index
    %2 = vector.load %arg3[%c0_2, %c0_3] : memref<8x4xbf16, #tpu.memory_space<vmem>>, vector<8x4xbf16>
    %cst = arith.constant dense<0.000000e+00> : vector<8x64xf32>
    %3 = tpu.matmul %2, %1, %cst {dimension_numbers = #tpu.dot_dimension_numbers<[1], [0], [0], [1], [0, 0, 1, 1], [], []>} : vector<8x4xbf16>, vector<4x64xbf16>, vector<8x64xf32> -> vector<8x64xf32>
    %c0_4 = arith.constant 0 : index
    %c0_5 = arith.constant 0 : index
    %4 = vector.load %arg4[%c0_4, %c0_5] : memref<8x1xf32, #tpu.memory_space<vmem>>, vector<8x1xf32>
    %5 = vector.broadcast %4 : vector<8x1xf32> to vector<8x64xf32>
    %6 = arith.addf %3, %5 : vector<8x64xf32>
    %cst_6 = arith.constant 0.000000e+00 : f32
    %7 = vector.broadcast %cst_6 : f32 to vector<8x64xf32>
    %8 = arith.maximumf %6, %7 : vector<8x64xf32>
    %c0_7 = arith.constant 0 : index
    %c0_8 = arith.constant 0 : index
    %c0_9 = arith.constant 0 : index
    %9 = vector.load %arg5[%c0_7, %c0_8, %c0_9] : memref<1x8x64xf32, #tpu.memory_space<vmem>>, vector<1x8x64xf32>
    %10 = vector.shape_cast %9 : vector<1x8x64xf32> to vector<8x64xf32>
    %11 = vector.shape_cast %8 : vector<8x64xf32> to vector<1x8x64xf32>
    tpu.vector_store %arg5[%c0_7, %c0_8, %c0_9], %11 {strides = array<i32>} : memref<1x8x64xf32, #tpu.memory_space<vmem>>, vector<1x8x64xf32>,
    return
  }
  func.func @transform_0(%arg0: i32, %arg1: i32) -> (i32, i32, i32) {
    %c0_i32 = arith.constant 0 : i32
    %c0_i32_0 = arith.constant 0 : i32
    return %arg0, %c0_i32, %arg1 : i32, i32, i32
  }
  func.func @transform_1(%arg0: i32, %arg1: i32) -> (i32, i32) {
    %c0_i32 = arith.constant 0 : i32
    %c0_i32_0 = arith.constant 0 : i32
    %c0_i32_1 = arith.constant 0 : i32
    return %c0_i32, %c0_i32_0 : i32, i32
  }
  func.func @transform_2(%arg0: i32, %arg1: i32) -> (i32, i32) {
    %c0_i32 = arith.constant 0 : i32
    %c0_i32_0 = arith.constant 0 : i32
    %c0_i32_1 = arith.constant 0 : i32
    return %c0_i32, %c0_i32_0 : i32, i32
  }
  func.func @transform_3(%arg0: i32, %arg1: i32) -> (i32, i32, i32) {
    %c0_i32 = arith.constant 0 : i32
    %c0_i32_0 = arith.constant 0 : i32
    return %arg0, %c0_i32, %arg1 : i32, i32, i32
  }
}

</mosaic_0001>

<bundles_post_ra>
// kernel: tpu_custom_call.1
= control target key start
LH: loop header
LB: loop body
LE: loop exit
PB: predicated region body
PF: predicated region fallthrough
CT: control target
= control target key end

     0   :  { %8 = vsyncpa [#allocation3], 0  ;;  %s638_s0 = inlined_call_operand.vmem [shape: bf16[2,4,64], index: 0, kind: input, shape index: {}]   ;;  %s639_s1 = inlined_call_operand.vmem [shape: bf16[8,4], index: 1, kind: input, shape index: {}]   ;;  %s640_s2 = inlined_call_operand.vmem [shape: f32[8,1], index: 2, kind: input, shape index: {}]   ;;  %s641_s3 = inlined_call_operand.hbm [shape: f32[2,8,64], index: 3, kind: output, shape index: {}]  }
   0x1   :  { %10 = vsyncpa [#allocation3 + $0x1], 0  ;;  %s520_s12 = smov 0   ;;  %s522_s13 = smov 0  }
   0x2   :  { %s524_s14 = smov 0   ;;  %s526_s15 = smov 0  }
   0x3   :  { %s528_s16 = smov 0   ;;  %s530_s17 = smov 0  }
   0x4 LB: > { %s337_s18 = sadd.s32 4294967295, %s494_s17   ;;  %s338_s19 = sadd.s32 4294967294, %s494_s17   ;;  %s494_s17 = sphi %s530_s17, %s16_s17   ;;  %s490_s16 = sphi %s528_s16, %s648_s16   ;;  %s486_s15 = sphi %s526_s15, %s647_s15   ;;  %s482_s14 = sphi %s524_s14, %s646_s14   ;;  %s478_s13 = sphi %s522_s13, %s645_s13   ;;  %s474_s12 = sphi %s520_s12, %s644_s12  }
   0x5   : > { %s28_s20 = sadd.s32 1, %s490_s16  ;;  %s107_s21 = sadd.s32 1, %s482_s14 }
   0x6   : > { %p30_p0 = scmp.ge.s32.totalorder %s28_s20, 2  ;;  %p117_p1 = scmp.ne.s32.totalorder %s482_s14, %s478_s13 }
   0x7   : > { %p118_p2 = scmp.eq.s32.totalorder %s337_s18, 1  ;;  %p123_p3 = scmp.ne.s32.totalorder %s478_s13, %s474_s12 }
   0x8   : > { %s650_s20 = smov (%p30_p0, %s28_s20), 0  ;;  %p124_p5 = scmp.eq.s32.totalorder %s338_s19, 1 }
   0x9   : > { %p560_p4 = por %p118_p2, %p117_p1  ;;  %s102_s23 = ssub.s32 %s490_s16, %s650_s20 }
   0xa   : > { %p341_p6 = scmp.ge.s32.totalorder %s494_s17, 1  ;;  %p105_p7 = scmp.eq.s32.totalorder %s102_s23, 0 }
   0xb   : > { %p567_p8 = por %p124_p5, %p123_p3  ;;  %p158_p9 = scmp.lt.s32.totalorder %s494_s17, 3 }
   0xc   : > { %s573_s25 = scalar_select %p105_p7, %s482_s14, %s107_s21  }
   0xd   : > { %p159_p10 = pnand %p341_p6, %p158_p9 }
   0xe   : > { %p184_p11 = scmp.lt.s32.totalorder (!%p159_p10), %s486_s15, 1  ;;  %v496_v0 = vmov (!%p159_p10), 0.0   ;;  %vm497_vm0 = vmmov (!%p159_p10), 0   ;;  %v194_v1 = vld [vmem:[%s640_s2] sm:$0xff] (!%p159_p10)  ;;  %v498_v2 = vmov (!%p159_p10), 0   ;;  %vm204_vm1 = vcmask (!%p159_p10), 1041408  }
   0xf   : > { %162 = sbr.rel (%p159_p10) target bundleno = 261 (0x105), region = 32  ;;  %351 = vmatprep.subr.bf16.mxu0 (!%p159_p10), %v496_v0  ;;  %353 = vmatprep.mubr.msk.bf16.mxu0 (!%p159_p10), %vm497_vm0, %v496_v0  ;;  %v193_v5 = vld [vmem:[%s639_s1] sm:$0xf] (!%p159_p10)  ;;  %vm200_vm2 = vcmask (!%p159_p10), 31744   ;;  %s181_s8 = sand.u32 (!%p159_p10), 1, %s478_s13   ;;  %vm249_vm3 = vcmask (!%p159_p10), 523264  }
  0x10   : > { %415 = vset.pattern.permute.xlu0 (!%p159_p10), %v498_v2  ;;  %s342_s9 = sshll.u32 (!%p159_p10), %s181_s8, 3  ;;  %s346_s10 = sshll.u32 (!%p159_p10), %s486_s15, 7 }
  0x11   : > { %197 = vperm.xlu0 (!%p159_p10), %415, %v194_v1   ;;  %s183_s11 = scalar_lea.vmem (!%p159_p10), [#allocation2], %s342_s9  ;;  %s591_s23 = scalar_lea.hbm (!%p159_p10), %s641_s3, %s346_s10 }
  0x12   : > { %s266_s18 = sshll.u32 (!%p159_p10), %s183_s11, 4  ;;  %s499_s27 = smov (!%p159_p10), [#allocation2]   ;;  %s593_s18 = int_to_ptr.vmem [resolvable:$true] %s266_s18 }
  0x13   : > { %s416_s26 = scalar_lea.vmem (!%p159_p10), %s593_s18, 128 }
  0x14   : > { %p417_p12 = scmp.ne.s32.totalorder (!%p159_p10), %s593_s18, %s416_s26 }
  0x16   : > { %s185_s28 = scalar_select %p184_p11, %s486_s15, 1 }
  0x17   : > { %s252_s15 = scalar_lea.sflag [#allocation3], %s181_s8  ;;  %p418_p13 = pnand %p417_p12, %p560_p4 }
  0x18   : > { %s343_s29 = sshll.u32 %s185_s28, 1  ;;  %s420_s28 = sshll.u32 %s499_s27, 4  ;;  %s421_s28 = int_to_ptr.vmem [resolvable:$false] %s420_s28 }
  0x19   : > { %s190_s5 = scalar_lea.vmem %s638_s0, %s343_s29  ;;  %p419_p0 = pneg %p418_p13 }
  0x1a   : > { %v192_v3 = vld [vmem:[%s190_s5] sm:$0x3]  ;;  %s422_s29 = scalar_lea.vmem %s421_s28, 256  ;;  %p423_p1 = scmp.lt.s32.totalorder %s593_s18, %s421_s28 }
  0x1b   : > { %v206_v4 = vsel %vm204_vm1, %v192_v3, 0  ;;  %p424_p2 = scmp.lt.s32.totalorder %s422_s29, %s416_s26 }
  0x1c   : > { %352 = vmatpush3.bf16.msra.mxu0 %v206_v4 }
  0x1d   : > { %p425_p3 = por %p424_p2, %p423_p1 }
  0x1f   : > { %354 = vmatmul.mubr.msk.bf16.vlgmr.msra.gmra.mrb[0].mxu0 %vm200_vm2, %v193_v5  ;;  %p426_p5 = pnand %p425_p3, %p419_p0 }
  0x90   : > { %v198_v6 = vpop.permute.xlu0 %197 }
  0xf2   : > { %v242_v7 = vpop.f32.mrb[0].mxu0 }
  0xf3   : > { %v243_v8 = vadd.f32 %v242_v7, %v198_v6  ;;  %v355_v9 = vpop.f32.mrb[1].mxu0 }
  0xf4   : > { %v245_v10 = vpop.f32.mrb[2].mxu0 }
  0xf5   : > { %v248_v11 = vmax.f32 %v243_v8, 0.0  ;;  %v356_v12 = vpop.f32.mrb[3].mxu0 }
  0xf7   : > { %250 = vst.msk [vmem:[%s183_s11] sm:$0xff] %vm249_vm3, %v248_v11 }
  0xf8   : > { %429 = shalt.err (!%p426_p5)
}
  0xf9   : > { %s430_s30 = scalar_lea.hbm %s591_s23, 128  ;;  %s434_s6 = scalar_lea.hbm %s641_s3, 256 }
  0xfa   : > { %p431_p6 = scmp.ne.s32.totalorder %s591_s23, %s430_s30  ;;  %p435_p10 = scmp.lt.u32.totalorder %s591_s23, %s641_s3 }
  0xfb   : > { %p436_p11 = scmp.lt.u32.totalorder %s434_s6, %s430_s30  ;;  %p438_p13 = scmp.lt.u32.totalorder %s430_s30, %s591_s23 }
  0xfc   : > { %p432_p7 = pnand %p431_p6, %p560_p4 }
  0xfd   : > { %p437_p12 = por %p436_p11, %p435_p10 }
  0xfe   : > { %p433_p9 = pneg %p432_p7 }
  0xff   : > { %p439_p0 = por %p438_p13, %p437_p12 }
 0x101   : > { %p440_p1 = pnand %p439_p0, %p433_p9 }
 0x103   : > { %443 = shalt.err (!%p440_p1)
}
 0x104   : > { %357 = dma.vmem_to_hbm [thread:$0]  (%p560_p4), %s593_s18, 128, %s591_s23, %s252_s15  }
 0x105 PF: > { %p363_p2 = scmp.ge.s32.totalorder %s494_s17, 2  ;;  %s278_s9 = sand.u32 1, %s474_s12  }
 0x106   : > { %s279_s10 = scalar_lea.sflag [#allocation3], %s278_s9 }
 0x107   : > { %p360_p3 = pnand %p363_p2, %p567_p8 }
 0x109   : > { %469 = dma.done.wait (!%p360_p3), %s279_s10, 128  }
 0x10a   : > { %471 = vsyncadd (!%p360_p3), %s279_s10, 4294967168  ;;  %s16_s17 = sadd.s32 1, %s494_s17   ;;  %s644_s12 = smov %s478_s13 }
 0x10b   : > { %p13_p5 = scmp.ge.s32.totalorder %s16_s17, 4   ;;  %s645_s13 = smov %s482_s14 }
 0x10c   : > { %s646_s14 = smov %s573_s25  ;;  %s647_s15 = smov %s490_s16 }
 0x10d   : > { %s648_s16 = smov %s650_s20  ;;  %15 = sbr.rel (!%p13_p5) target bundleno = 4 (0x4), region = 67 }
 0x114   :  { %284 = vsyncpa [#allocation3], 1 }
 0x115   :  { %286 = vsyncpa [#allocation3 + $0x1], 1 }

</bundles_post_ra>
